<compile_context>
chip_gen: v5e
topology: v5e:2x2
jax: 0.10.0
libtpu: 0.0.40
codegen_flags: <defaults>
</compile_context>

<pallas_src>
import functools
import math

import jax
import jax.numpy as jnp
from jax.experimental import pallas as pl
from jax.experimental.pallas import tpu as pltpu

LANE = 128  # lane width / padded Cout for lane-dense stores


# ------------------------------ Pallas kernels -------------------------------

def _conv_block_kernel(z_ref, w_ref, b_ref, s_ref, o_ref):
    """Fused Conv2d(3,2,1)-as-one-matmul + bias + LeakyReLU(0.2) + Dropout2d(id)
    + eval-mode BN shift, over a tile of batch-flattened output rows.

    z_ref : (tile_m, 16*Cin) bf16   space-to-depth rows (batch folded into M)
    w_ref : (16*Cin, 128)    bf16   conv taps, BN scale folded, Cout zero-padded
    b_ref : (1, 128)         f32    conv bias * BN scale (padded)
    s_ref : (1, 128)         f32    BN shift = beta - scale*mean (padded)
    o_ref : (tile_m, 128)           lane-dense output rows
    """
    acc = jnp.dot(z_ref[...], w_ref[...], preferred_element_type=jnp.float32)
    acc = acc + b_ref[...]
    acc = jnp.where(acc >= 0.0, acc, 0.2 * acc)          # LeakyReLU, f32 (v5e-safe)
    # Dropout2d(0.25): identity in eval mode.
    o_ref[...] = (acc + s_ref[...]).astype(o_ref.dtype)  # BN shift, single cast


def _tail_kernel(z_ref, w3_ref, b3_ref, s3_ref, w4_ref, b4_ref, s4_ref,
                 fw_ref, fb_ref, o_ref, *, nb):
    """Fused blocks 3 + 4 (Conv+LeakyReLU+Dropout(id)+BN) + FC + Sigmoid.

    Specialised to img_size == 16: block-3 output is 2x2/image, block-4 output
    is 1x1/image, FC input is exactly the 128 block-4 channels.

    z_ref  : (nb, 4, 16*C2) bf16  block-3 space-to-depth rows for nb images
    w3_ref : (16*C2, 64) bf16 ; b3/s3 : (1, 64) f32
    w4_ref : (4, 64, 128) bf16    the 4 interior taps (kh,kw) in {1,2}^2
    b4/s4  : (1, 128) f32
    fw_ref : (1, 128) f32 ; fb_ref : (1, 1) f32
    o_ref  : (nb, 1, 1) f32
    """
    w3 = w3_ref[...]
    b3 = b3_ref[...]
    s3 = s3_ref[...]
    b4 = b4_ref[...]
    s4 = s4_ref[...]
    fw = fw_ref[...]
    fb = fb_ref[...]
    for i in range(nb):  # static unroll over this step's images
        # ---- block 3: single (4, 16*C2) x (16*C2, 64) matmul ----
        x3 = jnp.dot(z_ref[i], w3, preferred_element_type=jnp.float32)   # (4, 64)
        x3 = x3 + b3
        x3 = jnp.where(x3 >= 0.0, x3, 0.2 * x3) + s3
        # ---- block 4: 1x1 output; rows of x3 are (p, q) row-major over 2x2 ----
        acc4 = b4                                                        # (1, 128)
        for k in range(4):
            row = x3[k:k + 1, :].astype(jnp.bfloat16)                    # (1, 64)
            acc4 = acc4 + jnp.dot(row, w4_ref[k],
                                  preferred_element_type=jnp.float32)
        x4 = jnp.where(acc4 >= 0.0, acc4, 0.2 * acc4) + s4               # (1, 128)
        # ---- FC(128 -> 1) + numerically stable sigmoid ----
        v = jnp.sum(x4 * fw, axis=-1, keepdims=True) + fb                # (1, 1)
        e = jnp.exp(-jnp.abs(v))
        p = jnp.where(v >= 0.0, 1.0 / (1.0 + e), e / (1.0 + e))
        o_ref[i] = p


# ----------------------------- Wrapper / layout -------------------------------

def _space_to_depth_patches(x_nhwc):
    """(N,H,W,C) -> (N*Ho*Wo, 16*C) bf16 rows for the stride-2 3x3 conv-as-matmul.

    Row (n,i,j) holds the 2x2 block-neighbourhood channels ordered
    (di, dj, a, b, cin) so the conv is a single matmul against the regrouped
    (16*Cin, Cout) weight.  ~4x the raw input bytes (vs 9x for im2col).
    """
    n, h, w, c = x_nhwc.shape
    ho, wo = h // 2, w // 2
    xp = jnp.pad(x_nhwc, ((0, 0), (1, 1), (1, 1), (0, 0)))
    y = xp.reshape(n, ho + 1, 2, wo + 1, 2, c).transpose(0, 1, 3, 2, 4, 5)
    y = y.reshape(n, ho + 1, wo + 1, 4 * c)
    z = jnp.concatenate([y[:, :, :wo, :], y[:, :, 1:wo + 1, :]], axis=-1)   # dj fold
    z = jnp.concatenate([z[:, :ho, :, :], z[:, 1:ho + 1, :, :]], axis=-1)   # di fold
    return z.reshape(n * ho * wo, 16 * c).astype(jnp.bfloat16)


def _pick_tile_m(m, cap=1024):
    """Largest power-of-two row tile <= cap that divides m and leaves >= 2 grid
    steps (so 'parallel' feeds both v7x TensorCores); single full tile fallback."""
    if m % 8 != 0:
        return m
    t = 8
    while (t * 2) <= cap and m % (t * 2) == 0 and (m // (t * 2)) >= 2:
        t *= 2
    return t


def _pick_tail_nb(n):
    """Images per tail step: largest divisor <= 8 that still leaves >= 2 steps."""
    best = 1
    for cand in range(1, min(n, 8) + 1):
        if n % cand == 0 and (n // cand) >= 2:
            best = cand
    return best


def _conv_block_call(z, w16, b, s, out_dtype=jnp.bfloat16):
    m, k = z.shape
    cp = w16.shape[-1]          # lane-padded Cout (128)
    tile_m = _pick_tile_m(m)
    grid = (m // tile_m,)
    flops = int(2 * m * k * cp)
    bytes_accessed = int(z.size * 2 + w16.size * 2 + m * cp * 2 + (b.size + s.size) * 4)
    return pl.pallas_call(
        _conv_block_kernel,
        out_shape=jax.ShapeDtypeStruct((m, cp), out_dtype),
        grid_spec=pltpu.PrefetchScalarGridSpec(
            num_scalar_prefetch=0,
            grid=grid,
            in_specs=[
                pl.BlockSpec((tile_m, k), lambda i: (i, 0)),
                pl.BlockSpec((k, cp), lambda i: (0, 0)),
                pl.BlockSpec((1, cp), lambda i: (0, 0)),
                pl.BlockSpec((1, cp), lambda i: (0, 0)),
            ],
            out_specs=pl.BlockSpec((tile_m, cp), lambda i: (i, 0)),
        ),
        compiler_params=pltpu.CompilerParams(dimension_semantics=("parallel",)),
        cost_estimate=pl.CostEstimate(flops=flops, transcendentals=0,
                                      bytes_accessed=bytes_accessed),
    )(z, w16, b, s)


def _tail_call(z3, t):
    n, m3, k3 = z3.shape        # (N, 4, 16*C2)
    nb = _pick_tail_nb(n)
    steps = n // nb
    flops = int(2 * n * (m3 * k3 * 64 + 4 * 64 * 128 + 128))
    bytes_accessed = int(z3.size * 2 + t["w3"].size * 2 + t["w4"].size * 2 + n * 4)
    kernel = functools.partial(_tail_kernel, nb=nb)
    out = pl.pallas_call(
        kernel,
        out_shape=jax.ShapeDtypeStruct((n, 1, 1), jnp.float32),
        grid_spec=pltpu.PrefetchScalarGridSpec(
            num_scalar_prefetch=0,
            grid=(steps,),
            in_specs=[
                pl.BlockSpec((nb, m3, k3), lambda i: (i, 0, 0)),
                pl.BlockSpec(t["w3"].shape, lambda i: (0, 0)),
                pl.BlockSpec(t["b3"].shape, lambda i: (0, 0)),
                pl.BlockSpec(t["s3"].shape, lambda i: (0, 0)),
                pl.BlockSpec(t["w4"].shape, lambda i: (0, 0, 0)),
                pl.BlockSpec(t["b4"].shape, lambda i: (0, 0)),
                pl.BlockSpec(t["s4"].shape, lambda i: (0, 0)),
                pl.BlockSpec(t["fw"].shape, lambda i: (0, 0)),
                pl.BlockSpec(t["fb"].shape, lambda i: (0, 0)),
            ],
            out_specs=pl.BlockSpec((nb, 1, 1), lambda i: (i, 0, 0)),
        ),
        compiler_params=pltpu.CompilerParams(dimension_semantics=("parallel",)),
        cost_estimate=pl.CostEstimate(flops=flops, transcendentals=int(n),
                                      bytes_accessed=bytes_accessed),
    )(z3, t["w3"], t["b3"], t["s3"], t["w4"], t["b4"], t["s4"], t["fw"], t["fb"])
    return out.reshape(n, 1)


# ---------------------------- Parameter preparation ---------------------------

def _prep_conv_w(w_oihw, bias, scale, shift, pad_cout=None):
    """Fold eval-mode BN scale (>0) into the conv, regroup the 3x3/stride-2 taps
    so the conv is ONE (16*Cin, Cout) matmul over space-to-depth rows; optionally
    zero-pad Cout for lane-dense stores."""
    cout, cin, _, _ = w_oihw.shape
    wk = jnp.transpose(w_oihw, (2, 3, 1, 0)) * scale              # (3,3,cin,cout) HWIO
    b = (bias * scale).astype(jnp.float32)
    s = shift.astype(jnp.float32)
    wk = jnp.pad(wk, ((0, 1), (0, 1), (0, 0), (0, 0)))            # (4,4,cin,cout)
    wk = wk.reshape(2, 2, 2, 2, cin, cout)                        # (di,a,dj,b,ci,co)
    wk = jnp.transpose(wk, (0, 2, 1, 3, 4, 5))                    # (di,dj,a,b,ci,co)
    w16 = wk.reshape(16 * cin, cout)
    if pad_cout is not None and pad_cout > cout:
        pad = pad_cout - cout
        w16 = jnp.pad(w16, ((0, 0), (0, pad)))
        b = jnp.pad(b, (0, pad))
        s = jnp.pad(s, (0, pad))
    return (w16.astype(jnp.bfloat16), b.reshape(1, -1), s.reshape(1, -1))


def _prep_block4_taps(w_oihw, bias, scale, shift):
    """Block-4 input is 2x2 (img_size==16): the single output position only sees
    taps (kh,kw) in {1,2}x{1,2}, hitting input (p,q)=(kh-1,kw-1)."""
    wk = jnp.transpose(w_oihw, (2, 3, 1, 0)) * scale              # (3,3,64,128) HWIO
    taps = wk[1:3, 1:3].reshape(4, wk.shape[2], wk.shape[3])      # row-major (p,q)
    b = (bias * scale).reshape(1, -1).astype(jnp.float32)
    s = shift.reshape(1, -1).astype(jnp.float32)
    return taps.astype(jnp.bfloat16), b, s


def prepare_kernel_params(raw, img_size):
    assert img_size == 16, "fused tail kernel is specialized to img_size == 16"
    eps = raw["eps"]

    def bn_scale_shift(blk):
        if blk["bn"]:
            scale = blk["gamma"] / jnp.sqrt(blk["var"] + eps)
            shift = blk["beta"] - scale * blk["mean"]      # correct for loaded stats
        else:
            scale = jnp.ones_like(blk["b"])
            shift = jnp.zeros_like(blk["b"])
        return scale, shift

    head = []
    for blk in raw["blocks"][:2]:
        scale, shift = bn_scale_shift(blk)
        w16, b, s = _prep_conv_w(blk["w"], blk["b"], scale, shift, pad_cout=LANE)
        head.append(dict(w=w16, b=b, s=s, cout=blk["cout"]))

    blk3, blk4 = raw["blocks"][2], raw["blocks"][3]
    sc3, sh3 = bn_scale_shift(blk3)
    w3, b3, s3 = _prep_conv_w(blk3["w"], blk3["b"], sc3, sh3, pad_cout=None)
    sc4, sh4 = bn_scale_shift(blk4)
    w4, b4, s4 = _prep_block4_taps(blk4["w"], blk4["b"], sc4, sh4)
    # ds == 1 -> NCHW flatten of (128,1,1) equals channel order: no permutation.
    fw = raw["fc_w"].astype(jnp.float32)                  # (1, 128)
    fb = raw["fc_b"].reshape(1, 1).astype(jnp.float32)
    tail = dict(w3=w3, b3=b3, s3=s3, w4=w4, b4=b4, s4=s4, fw=fw, fb=fb)
    return dict(head=head, tail=tail)


def init_params(key, img_size=16, channels=3):
    """Deterministic PyTorch-default-style init (uniform +-1/sqrt(fan_in))."""
    eps = 0.8  # nn.BatchNorm2d(out_filters, 0.8) -> eps=0.8
    block_defs = [(channels, 16, False), (16, 32, True), (32, 64, True), (64, 128, True)]
    blocks = []
    for cin, cout, bn in block_defs:
        key, k_w, k_b = jax.random.split(key, 3)
        bound = 1.0 / math.sqrt(cin * 9)
        w = jax.random.uniform(k_w, (cout, cin, 3, 3), jnp.float32, -bound, bound)
        b = jax.random.uniform(k_b, (cout,), jnp.float32, -bound, bound)
        blocks.append(dict(
            w=w, b=b, bn=bn, cout=cout,
            gamma=jnp.ones((cout,), jnp.float32), beta=jnp.zeros((cout,), jnp.float32),
            mean=jnp.zeros((cout,), jnp.float32), var=jnp.ones((cout,), jnp.float32)))

    ds = img_size // 16
    d_in = 128 * ds * ds
    key, k_w, k_b = jax.random.split(key, 3)
    bound = 1.0 / math.sqrt(d_in)
    fc_w = jax.random.uniform(k_w, (1, d_in), jnp.float32, -bound, bound)
    fc_b = jax.random.uniform(k_b, (1,), jnp.float32, -bound, bound)

    raw = dict(blocks=blocks, fc_w=fc_w, fc_b=fc_b, eps=eps)
    return raw, prepare_kernel_params(raw, img_size)


# -------------------------------- Forward pass --------------------------------

def discriminator_forward(prepped, img_nchw):
    x = jnp.transpose(img_nchw, (0, 2, 3, 1))             # NCHW -> NHWC (only once)
    n = x.shape[0]
    # Blocks 1 & 2: one batch-flattened matmul kernel each, lane-dense outputs.
    for blk in prepped["head"]:
        h, w = x.shape[1], x.shape[2]
        ho, wo = h // 2, w // 2
        z = _space_to_depth_patches(x)                     # (n*ho*wo, 16*cin) bf16
        out = _conv_block_call(z, blk["w"], blk["b"], blk["s"])   # (n*ho*wo, 128)
        x = out[:, :blk["cout"]].reshape(n, ho, wo, blk["cout"])
    # Fused tail: blocks 3 + 4 + FC + Sigmoid in one kernel.
    assert x.shape[1] == 4 and x.shape[2] == 4
    m3 = (x.shape[1] // 2) * (x.shape[2] // 2)
    z3 = _space_to_depth_patches(x).reshape(n, m3, 16 * x.shape[-1])   # (n, 4, 512)
    return _tail_call(z3, prepped["tail"])                 # (n, 1) f32


# ----------------------------- Pure-JAX reference ------------------------------

def _reference_forward(raw, img_nchw):
    """Eval-mode f32 reference for correctness checking (no Pallas)."""
    eps = raw["eps"]
    x = img_nchw
    for blk in raw["blocks"]:
        x = jax.lax.conv_general_dilated(
            x, blk["w"], window_strides=(2, 2), padding=((1, 1), (1, 1)),
            dimension_numbers=("NCHW", "OIHW", "NCHW"))
        x = x + blk["b"].reshape(1, -1, 1, 1)
        x = jnp.where(x >= 0.0, x, 0.2 * x)                # LeakyReLU; Dropout2d eval=id
        if blk["bn"]:
            inv = blk["gamma"] / jnp.sqrt(blk["var"] + eps)
            x = (x - blk["mean"].reshape(1, -1, 1, 1)) * inv.reshape(1, -1, 1, 1) \
                + blk["beta"].reshape(1, -1, 1, 1)
    n = x.shape[0]
    flat = x.reshape(n, -1)
    v = flat @ raw["fc_w"].T + raw["fc_b"]
    return jax.nn.sigmoid(v)


# --------------------------------- Entry point --------------------------------

if __name__ == "__main__":
    key = jax.random.PRNGKey(0)
    k_params, k_img = jax.random.split(key)

    batch, channels, img_size = 2, 3, 16    # small but consistent (img_size == 16)
    raw, prepped = init_params(k_params, img_size=img_size, channels=channels)
    img = jax.random.normal(k_img, (batch, channels, img_size, img_size), jnp.float32)

    fwd = jax.jit(functools.partial(discriminator_forward, prepped))
    out = fwd(img)
    jax.block_until_ready(out)

    assert out.shape == (batch, 1)
    assert bool(jnp.all((out >= 0.0) & (out <= 1.0)))

    ref = _reference_forward(raw, img)
    assert bool(jnp.allclose(out, ref, atol=3e-2)), (out, ref)   # bf16-intermediate drift

    print("KERNEL_OK")
</pallas_src>

<mosaic_0001>
module attributes {stable_mosaic.version = 11 : i64} {
  func.func @_conv_block_kernel(%arg0: i32, %arg1: memref<64x48xbf16, #tpu.memory_space<vmem>>, %arg2: memref<48x128xbf16, #tpu.memory_space<vmem>>, %arg3: memref<1x128xf32, #tpu.memory_space<vmem>>, %arg4: memref<1x128xf32, #tpu.memory_space<vmem>>, %arg5: memref<64x128xbf16, #tpu.memory_space<vmem>>) attributes {dimension_semantics = [#tpu.dimension_semantics<parallel>], iteration_bounds = array<i64: 2>, scalar_prefetch = 0 : i64, scratch_operands = 0 : i64, tpu.core_type = #tpu.core_type<tc>, window_params = [{transform_indices = @transform_0, window_bounds = array<i64: 64, 48>}, {pipeline_mode = #tpu.pipeline_mode<synchronous>, transform_indices = @transform_1, window_bounds = array<i64: 48, 128>}, {pipeline_mode = #tpu.pipeline_mode<synchronous>, transform_indices = @transform_2, window_bounds = array<i64: 1, 128>}, {pipeline_mode = #tpu.pipeline_mode<synchronous>, transform_indices = @transform_3, window_bounds = array<i64: 1, 128>}, {transform_indices = @transform_4, window_bounds = array<i64: 64, 128>}]} {
    %c0 = arith.constant 0 : index
    %c0_0 = arith.constant 0 : index
    %0 = vector.load %arg1[%c0, %c0_0] : memref<64x48xbf16, #tpu.memory_space<vmem>>, vector<64x48xbf16>
    %c0_1 = arith.constant 0 : index
    %c0_2 = arith.constant 0 : index
    %1 = vector.load %arg2[%c0_1, %c0_2] : memref<48x128xbf16, #tpu.memory_space<vmem>>, vector<48x128xbf16>
    %cst = arith.constant dense<0.000000e+00> : vector<64x128xf32>
    %2 = tpu.matmul %0, %1, %cst {dimension_numbers = #tpu.dot_dimension_numbers<[1], [0], [0], [1], [0, 0, 1, 1], [], []>} : vector<64x48xbf16>, vector<48x128xbf16>, vector<64x128xf32> -> vector<64x128xf32>
    %c0_3 = arith.constant 0 : index
    %c0_4 = arith.constant 0 : index
    %3 = vector.load %arg3[%c0_3, %c0_4] : memref<1x128xf32, #tpu.memory_space<vmem>>, vector<1x128xf32>
    %4 = vector.broadcast %3 : vector<1x128xf32> to vector<64x128xf32>
    %5 = arith.addf %2, %4 : vector<64x128xf32>
    %cst_5 = arith.constant 0.000000e+00 : f32
    %6 = vector.broadcast %cst_5 : f32 to vector<64x128xf32>
    %7 = arith.cmpf oge, %5, %6 : vector<64x128xf32>
    %cst_6 = arith.constant 2.000000e-01 : f32
    %8 = vector.broadcast %cst_6 : f32 to vector<64x128xf32>
    %9 = arith.mulf %8, %5 : vector<64x128xf32>
    %10 = arith.select %7, %5, %9 : vector<64x128xi1>, vector<64x128xf32>
    %c0_7 = arith.constant 0 : index
    %c0_8 = arith.constant 0 : index
    %11 = vector.load %arg4[%c0_7, %c0_8] : memref<1x128xf32, #tpu.memory_space<vmem>>, vector<1x128xf32>
    %12 = vector.broadcast %11 : vector<1x128xf32> to vector<64x128xf32>
    %13 = arith.addf %10, %12 : vector<64x128xf32>
    %14 = arith.truncf %13 : vector<64x128xf32> to vector<64x128xbf16>
    %c0_9 = arith.constant 0 : index
    %c0_10 = arith.constant 0 : index
    %15 = vector.load %arg5[%c0_9, %c0_10] : memref<64x128xbf16, #tpu.memory_space<vmem>>, vector<64x128xbf16>
    tpu.vector_store %arg5[%c0_9, %c0_10], %14 {strides = array<i32>} : memref<64x128xbf16, #tpu.memory_space<vmem>>, vector<64x128xbf16>,
    return
  }
  func.func @transform_0(%arg0: i32) -> (i32, i32) {
    %c0_i32 = arith.constant 0 : i32
    %c0_i32_0 = arith.constant 0 : i32
    return %arg0, %c0_i32 : i32, i32
  }
  func.func @transform_1(%arg0: i32) -> (i32, i32) {
    %c0_i32 = arith.constant 0 : i32
    %c0_i32_0 = arith.constant 0 : i32
    %c0_i32_1 = arith.constant 0 : i32
    return %c0_i32, %c0_i32_0 : i32, i32
  }
  func.func @transform_2(%arg0: i32) -> (i32, i32) {
    %c0_i32 = arith.constant 0 : i32
    %c0_i32_0 = arith.constant 0 : i32
    %c0_i32_1 = arith.constant 0 : i32
    return %c0_i32, %c0_i32_0 : i32, i32
  }
  func.func @transform_3(%arg0: i32) -> (i32, i32) {
    %c0_i32 = arith.constant 0 : i32
    %c0_i32_0 = arith.constant 0 : i32
    %c0_i32_1 = arith.constant 0 : i32
    return %c0_i32, %c0_i32_0 : i32, i32
  }
  func.func @transform_4(%arg0: i32) -> (i32, i32) {
    %c0_i32 = arith.constant 0 : i32
    %c0_i32_0 = arith.constant 0 : i32
    return %arg0, %c0_i32 : i32, i32
  }
}

module attributes {stable_mosaic.version = 11 : i64} {
  func.func @_conv_block_kernel(%arg0: i32, %arg1: memref<16x256xbf16, #tpu.memory_space<vmem>>, %arg2: memref<256x128xbf16, #tpu.memory_space<vmem>>, %arg3: memref<1x128xf32, #tpu.memory_space<vmem>>, %arg4: memref<1x128xf32, #tpu.memory_space<vmem>>, %arg5: memref<16x128xbf16, #tpu.memory_space<vmem>>) attributes {dimension_semantics = [#tpu.dimension_semantics<parallel>], iteration_bounds = array<i64: 2>, scalar_prefetch = 0 : i64, scratch_operands = 0 : i64, tpu.core_type = #tpu.core_type<tc>, window_params = [{transform_indices = @transform_0, window_bounds = array<i64: 16, 256>}, {pipeline_mode = #tpu.pipeline_mode<synchronous>, transform_indices = @transform_1, window_bounds = array<i64: 256, 128>}, {pipeline_mode = #tpu.pipeline_mode<synchronous>, transform_indices = @transform_2, window_bounds = array<i64: 1, 128>}, {pipeline_mode = #tpu.pipeline_mode<synchronous>, transform_indices = @transform_3, window_bounds = array<i64: 1, 128>}, {transform_indices = @transform_4, window_bounds = array<i64: 16, 128>}]} {
    %c0 = arith.constant 0 : index
    %c0_0 = arith.constant 0 : index
    %0 = vector.load %arg1[%c0, %c0_0] : memref<16x256xbf16, #tpu.memory_space<vmem>>, vector<16x256xbf16>
    %c0_1 = arith.constant 0 : index
    %c0_2 = arith.constant 0 : index
    %1 = vector.load %arg2[%c0_1, %c0_2] : memref<256x128xbf16, #tpu.memory_space<vmem>>, vector<256x128xbf16>
    %cst = arith.constant dense<0.000000e+00> : vector<16x128xf32>
    %2 = tpu.matmul %0, %1, %cst {dimension_numbers = #tpu.dot_dimension_numbers<[1], [0], [0], [1], [0, 0, 1, 1], [], []>} : vector<16x256xbf16>, vector<256x128xbf16>, vector<16x128xf32> -> vector<16x128xf32>
    %c0_3 = arith.constant 0 : index
    %c0_4 = arith.constant 0 : index
    %3 = vector.load %arg3[%c0_3, %c0_4] : memref<1x128xf32, #tpu.memory_space<vmem>>, vector<1x128xf32>
    %4 = vector.broadcast %3 : vector<1x128xf32> to vector<16x128xf32>
    %5 = arith.addf %2, %4 : vector<16x128xf32>
    %cst_5 = arith.constant 0.000000e+00 : f32
    %6 = vector.broadcast %cst_5 : f32 to vector<16x128xf32>
    %7 = arith.cmpf oge, %5, %6 : vector<16x128xf32>
    %cst_6 = arith.constant 2.000000e-01 : f32
    %8 = vector.broadcast %cst_6 : f32 to vector<16x128xf32>
    %9 = arith.mulf %8, %5 : vector<16x128xf32>
    %10 = arith.select %7, %5, %9 : vector<16x128xi1>, vector<16x128xf32>
    %c0_7 = arith.constant 0 : index
    %c0_8 = arith.constant 0 : index
    %11 = vector.load %arg4[%c0_7, %c0_8] : memref<1x128xf32, #tpu.memory_space<vmem>>, vector<1x128xf32>
    %12 = vector.broadcast %11 : vector<1x128xf32> to vector<16x128xf32>
    %13 = arith.addf %10, %12 : vector<16x128xf32>
    %14 = arith.truncf %13 : vector<16x128xf32> to vector<16x128xbf16>
    %c0_9 = arith.constant 0 : index
    %c0_10 = arith.constant 0 : index
    %15 = vector.load %arg5[%c0_9, %c0_10] : memref<16x128xbf16, #tpu.memory_space<vmem>>, vector<16x128xbf16>
    tpu.vector_store %arg5[%c0_9, %c0_10], %14 {strides = array<i32>} : memref<16x128xbf16, #tpu.memory_space<vmem>>, vector<16x128xbf16>,
    return
  }
  func.func @transform_0(%arg0: i32) -> (i32, i32) {
    %c0_i32 = arith.constant 0 : i32
    %c0_i32_0 = arith.constant 0 : i32
    return %arg0, %c0_i32 : i32, i32
  }
  func.func @transform_1(%arg0: i32) -> (i32, i32) {
    %c0_i32 = arith.constant 0 : i32
    %c0_i32_0 = arith.constant 0 : i32
    %c0_i32_1 = arith.constant 0 : i32
    return %c0_i32, %c0_i32_0 : i32, i32
  }
  func.func @transform_2(%arg0: i32) -> (i32, i32) {
    %c0_i32 = arith.constant 0 : i32
    %c0_i32_0 = arith.constant 0 : i32
    %c0_i32_1 = arith.constant 0 : i32
    return %c0_i32, %c0_i32_0 : i32, i32
  }
  func.func @transform_3(%arg0: i32) -> (i32, i32) {
    %c0_i32 = arith.constant 0 : i32
    %c0_i32_0 = arith.constant 0 : i32
    %c0_i32_1 = arith.constant 0 : i32
    return %c0_i32, %c0_i32_0 : i32, i32
  }
  func.func @transform_4(%arg0: i32) -> (i32, i32) {
    %c0_i32 = arith.constant 0 : i32
    %c0_i32_0 = arith.constant 0 : i32
    return %arg0, %c0_i32 : i32, i32
  }
}

module attributes {stable_mosaic.version = 11 : i64} {
  func.func @_tail_kernel(%arg0: i32, %arg1: memref<1x4x512xbf16, #tpu.memory_space<vmem>>, %arg2: memref<512x64xbf16, #tpu.memory_space<vmem>>, %arg3: memref<1x64xf32, #tpu.memory_space<vmem>>, %arg4: memref<1x64xf32, #tpu.memory_space<vmem>>, %arg5: memref<4x64x128xbf16, #tpu.memory_space<vmem>>, %arg6: memref<1x128xf32, #tpu.memory_space<vmem>>, %arg7: memref<1x128xf32, #tpu.memory_space<vmem>>, %arg8: memref<1x128xf32, #tpu.memory_space<vmem>>, %arg9: memref<1x1xf32, #tpu.memory_space<vmem>>, %arg10: memref<1x1x1xf32, #tpu.memory_space<vmem>>) attributes {dimension_semantics = [#tpu.dimension_semantics<parallel>], iteration_bounds = array<i64: 2>, scalar_prefetch = 0 : i64, scratch_operands = 0 : i64, tpu.core_type = #tpu.core_type<tc>, window_params = [{transform_indices = @transform_0, window_bounds = array<i64: 1, 4, 512>}, {pipeline_mode = #tpu.pipeline_mode<synchronous>, transform_indices = @transform_1, window_bounds = array<i64: 512, 64>}, {pipeline_mode = #tpu.pipeline_mode<synchronous>, transform_indices = @transform_2, window_bounds = array<i64: 1, 64>}, {pipeline_mode = #tpu.pipeline_mode<synchronous>, transform_indices = @transform_3, window_bounds = array<i64: 1, 64>}, {pipeline_mode = #tpu.pipeline_mode<synchronous>, transform_indices = @transform_4, window_bounds = array<i64: 4, 64, 128>}, {pipeline_mode = #tpu.pipeline_mode<synchronous>, transform_indices = @transform_5, window_bounds = array<i64: 1, 128>}, {pipeline_mode = #tpu.pipeline_mode<synchronous>, transform_indices = @transform_6, window_bounds = array<i64: 1, 128>}, {pipeline_mode = #tpu.pipeline_mode<synchronous>, transform_indices = @transform_7, window_bounds = array<i64: 1, 128>}, {pipeline_mode = #tpu.pipeline_mode<synchronous>, transform_indices = @transform_8, window_bounds = array<i64: 1, 1>}, {transform_indices = @transform_9, window_bounds = array<i64: 1, 1, 1>}]} {
    %c0 = arith.constant 0 : index
    %c0_0 = arith.constant 0 : index
    %0 = vector.load %arg2[%c0, %c0_0] : memref<512x64xbf16, #tpu.memory_space<vmem>>, vector<512x64xbf16>
    %c0_1 = arith.constant 0 : index
    %c0_2 = arith.constant 0 : index
    %1 = vector.load %arg3[%c0_1, %c0_2] : memref<1x64xf32, #tpu.memory_space<vmem>>, vector<1x64xf32>
    %c0_3 = arith.constant 0 : index
    %c0_4 = arith.constant 0 : index
    %2 = vector.load %arg4[%c0_3, %c0_4] : memref<1x64xf32, #tpu.memory_space<vmem>>, vector<1x64xf32>
    %c0_5 = arith.constant 0 : index
    %c0_6 = arith.constant 0 : index
    %3 = vector.load %arg6[%c0_5, %c0_6] : memref<1x128xf32, #tpu.memory_space<vmem>>, vector<1x128xf32>
    %c0_7 = arith.constant 0 : index
    %c0_8 = arith.constant 0 : index
    %4 = vector.load %arg7[%c0_7, %c0_8] : memref<1x128xf32, #tpu.memory_space<vmem>>, vector<1x128xf32>
    %c0_9 = arith.constant 0 : index
    %c0_10 = arith.constant 0 : index
    %5 = vector.load %arg8[%c0_9, %c0_10] : memref<1x128xf32, #tpu.memory_space<vmem>>, vector<1x128xf32>
    %c0_11 = arith.constant 0 : index
    %c0_12 = arith.constant 0 : index
    %6 = vector.load %arg9[%c0_11, %c0_12] : memref<1x1xf32, #tpu.memory_space<vmem>>, vector<1x1xf32>
    %c0_13 = arith.constant 0 : index
    %c0_14 = arith.constant 0 : index
    %c0_15 = arith.constant 0 : index
    %7 = vector.load %arg1[%c0_13, %c0_14, %c0_15] : memref<1x4x512xbf16, #tpu.memory_space<vmem>>, vector<1x4x512xbf16>
    %8 = vector.shape_cast %7 : vector<1x4x512xbf16> to vector<4x512xbf16>
    %cst = arith.constant dense<0.000000e+00> : vector<4x64xf32>
    %9 = tpu.matmul %8, %0, %cst {dimension_numbers = #tpu.dot_dimension_numbers<[1], [0], [0], [1], [0, 0, 1, 1], [], []>} : vector<4x512xbf16>, vector<512x64xbf16>, vector<4x64xf32> -> vector<4x64xf32>
    %10 = vector.broadcast %1 : vector<1x64xf32> to vector<4x64xf32>
    %11 = arith.addf %9, %10 : vector<4x64xf32>
    %cst_16 = arith.constant 0.000000e+00 : f32
    %12 = vector.broadcast %cst_16 : f32 to vector<4x64xf32>
    %13 = arith.cmpf oge, %11, %12 : vector<4x64xf32>
    %cst_17 = arith.constant 2.000000e-01 : f32
    %14 = vector.broadcast %cst_17 : f32 to vector<4x64xf32>
    %15 = arith.mulf %14, %11 : vector<4x64xf32>
    %16 = arith.select %13, %11, %15 : vector<4x64xi1>, vector<4x64xf32>
    %17 = vector.broadcast %2 : vector<1x64xf32> to vector<4x64xf32>
    %18 = arith.addf %16, %17 : vector<4x64xf32>
    %19 = vector.extract_strided_slice %18 {offsets = [0, 0], sizes = [1, 64], strides = [1, 1]} : vector<4x64xf32> to vector<1x64xf32>
    %20 = arith.truncf %19 : vector<1x64xf32> to vector<1x64xbf16>
    %c0_18 = arith.constant 0 : index
    %c0_19 = arith.constant 0 : index
    %c0_20 = arith.constant 0 : index
    %21 = vector.load %arg5[%c0_18, %c0_19, %c0_20] : memref<4x64x128xbf16, #tpu.memory_space<vmem>>, vector<1x64x128xbf16>
    %22 = vector.shape_cast %21 : vector<1x64x128xbf16> to vector<64x128xbf16>
    %cst_21 = arith.constant dense<0.000000e+00> : vector<1x128xf32>
    %23 = tpu.matmul %20, %22, %cst_21 {dimension_numbers = #tpu.dot_dimension_numbers<[1], [0], [0], [1], [0, 0, 1, 1], [], []>} : vector<1x64xbf16>, vector<64x128xbf16>, vector<1x128xf32> -> vector<1x128xf32>
    %24 = arith.addf %3, %23 : vector<1x128xf32>
    %25 = vector.extract_strided_slice %18 {offsets = [1, 0], sizes = [1, 64], strides = [1, 1]} : vector<4x64xf32> to vector<1x64xf32>
    %26 = arith.truncf %25 : vector<1x64xf32> to vector<1x64xbf16>
    %c1 = arith.constant 1 : index
    %c0_22 = arith.constant 0 : index
    %c0_23 = arith.constant 0 : index
    %27 = vector.load %arg5[%c1, %c0_22, %c0_23] : memref<4x64x128xbf16, #tpu.memory_space<vmem>>, vector<1x64x128xbf16>
    %28 = vector.shape_cast %27 : vector<1x64x128xbf16> to vector<64x128xbf16>
    %cst_24 = arith.constant dense<0.000000e+00> : vector<1x128xf32>
    %29 = tpu.matmul %26, %28, %cst_24 {dimension_numbers = #tpu.dot_dimension_numbers<[1], [0], [0], [1], [0, 0, 1, 1], [], []>} : vector<1x64xbf16>, vector<64x128xbf16>, vector<1x128xf32> -> vector<1x128xf32>
    %30 = arith.addf %24, %29 : vector<1x128xf32>
    %31 = vector.extract_strided_slice %18 {offsets = [2, 0], sizes = [1, 64], strides = [1, 1]} : vector<4x64xf32> to vector<1x64xf32>
    %32 = arith.truncf %31 : vector<1x64xf32> to vector<1x64xbf16>
    %c2 = arith.constant 2 : index
    %c0_25 = arith.constant 0 : index
    %c0_26 = arith.constant 0 : index
    %33 = vector.load %arg5[%c2, %c0_25, %c0_26] : memref<4x64x128xbf16, #tpu.memory_space<vmem>>, vector<1x64x128xbf16>
    %34 = vector.shape_cast %33 : vector<1x64x128xbf16> to vector<64x128xbf16>
    %cst_27 = arith.constant dense<0.000000e+00> : vector<1x128xf32>
    %35 = tpu.matmul %32, %34, %cst_27 {dimension_numbers = #tpu.dot_dimension_numbers<[1], [0], [0], [1], [0, 0, 1, 1], [], []>} : vector<1x64xbf16>, vector<64x128xbf16>, vector<1x128xf32> -> vector<1x128xf32>
    %36 = arith.addf %30, %35 : vector<1x128xf32>
    %37 = vector.extract_strided_slice %18 {offsets = [3, 0], sizes = [1, 64], strides = [1, 1]} : vector<4x64xf32> to vector<1x64xf32>
    %38 = arith.truncf %37 : vector<1x64xf32> to vector<1x64xbf16>
    %c3 = arith.constant 3 : index
    %c0_28 = arith.constant 0 : index
    %c0_29 = arith.constant 0 : index
    %39 = vector.load %arg5[%c3, %c0_28, %c0_29] : memref<4x64x128xbf16, #tpu.memory_space<vmem>>, vector<1x64x128xbf16>
    %40 = vector.shape_cast %39 : vector<1x64x128xbf16> to vector<64x128xbf16>
    %cst_30 = arith.constant dense<0.000000e+00> : vector<1x128xf32>
    %41 = tpu.matmul %38, %40, %cst_30 {dimension_numbers = #tpu.dot_dimension_numbers<[1], [0], [0], [1], [0, 0, 1, 1], [], []>} : vector<1x64xbf16>, vector<64x128xbf16>, vector<1x128xf32> -> vector<1x128xf32>
    %42 = arith.addf %36, %41 : vector<1x128xf32>
    %cst_31 = arith.constant 0.000000e+00 : f32
    %43 = vector.broadcast %cst_31 : f32 to vector<1x128xf32>
    %44 = arith.cmpf oge, %42, %43 : vector<1x128xf32>
    %cst_32 = arith.constant 2.000000e-01 : f32
    %45 = vector.broadcast %cst_32 : f32 to vector<1x128xf32>
    %46 = arith.mulf %45, %42 : vector<1x128xf32>
    %47 = arith.select %44, %42, %46 : vector<1x128xi1>, vector<1x128xf32>
    %48 = arith.addf %47, %4 : vector<1x128xf32>
    %49 = arith.mulf %48, %5 : vector<1x128xf32>
    %cst_33 = arith.constant dense<0.000000e+00> : vector<1xf32>
    %50 = vector.multi_reduction <add>, %49, %cst_33 [1] : vector<1x128xf32> to vector<1xf32>
    %51 = vector.shape_cast %50 : vector<1xf32> to vector<1x1xf32>
    %52 = arith.addf %51, %6 : vector<1x1xf32>
    %53 = math.absf %52 : vector<1x1xf32>
    %cst_34 = arith.constant 0.000000e+00 : f32
    %54 = vector.broadcast %cst_34 : f32 to vector<1x1xf32>
    %55 = arith.subf %54, %53 : vector<1x1xf32>
    %56 = math.exp %55 : vector<1x1xf32>
    %cst_35 = arith.constant 0.000000e+00 : f32
    %57 = vector.broadcast %cst_35 : f32 to vector<1x1xf32>
    %58 = arith.cmpf oge, %52, %57 : vector<1x1xf32>
    %cst_36 = arith.constant 1.000000e+00 : f32
    %59 = vector.broadcast %cst_36 : f32 to vector<1x1xf32>
    %60 = arith.addf %59, %56 : vector<1x1xf32>
    %cst_37 = arith.constant 1.000000e+00 : f32
    %61 = vector.broadcast %cst_37 : f32 to vector<1x1xf32>
    %62 = arith.divf %61, %60 : vector<1x1xf32>
    %cst_38 = arith.constant 1.000000e+00 : f32
    %63 = vector.broadcast %cst_38 : f32 to vector<1x1xf32>
    %64 = arith.addf %63, %56 : vector<1x1xf32>
    %65 = arith.divf %56, %64 : vector<1x1xf32>
    %66 = arith.select %58, %62, %65 : vector<1x1xi1>, vector<1x1xf32>
    %c0_39 = arith.constant 0 : index
    %c0_40 = arith.constant 0 : index
    %c0_41 = arith.constant 0 : index
    %67 = vector.load %arg10[%c0_39, %c0_40, %c0_41] : memref<1x1x1xf32, #tpu.memory_space<vmem>>, vector<1x1x1xf32>
    %68 = vector.shape_cast %67 : vector<1x1x1xf32> to vector<1x1xf32>
    %69 = vector.shape_cast %66 : vector<1x1xf32> to vector<1x1x1xf32>
    tpu.vector_store %arg10[%c0_39, %c0_40, %c0_41], %69 {strides = array<i32>} : memref<1x1x1xf32, #tpu.memory_space<vmem>>, vector<1x1x1xf32>,
    return
  }
  func.func @transform_0(%arg0: i32) -> (i32, i32, i32) {
    %c0_i32 = arith.constant 0 : i32
    %c0_i32_0 = arith.constant 0 : i32
    %c0_i32_1 = arith.constant 0 : i32
    return %arg0, %c0_i32, %c0_i32_0 : i32, i32, i32
  }
  func.func @transform_1(%arg0: i32) -> (i32, i32) {
    %c0_i32 = arith.constant 0 : i32
    %c0_i32_0 = arith.constant 0 : i32
    %c0_i32_1 = arith.constant 0 : i32
    return %c0_i32, %c0_i32_0 : i32, i32
  }
  func.func @transform_2(%arg0: i32) -> (i32, i32) {
    %c0_i32 = arith.constant 0 : i32
    %c0_i32_0 = arith.constant 0 : i32
    %c0_i32_1 = arith.constant 0 : i32
    return %c0_i32, %c0_i32_0 : i32, i32
  }
  func.func @transform_3(%arg0: i32) -> (i32, i32) {
    %c0_i32 = arith.constant 0 : i32
    %c0_i32_0 = arith.constant 0 : i32
    %c0_i32_1 = arith.constant 0 : i32
    return %c0_i32, %c0_i32_0 : i32, i32
  }
  func.func @transform_4(%arg0: i32) -> (i32, i32, i32) {
    %c0_i32 = arith.constant 0 : i32
    %c0_i32_0 = arith.constant 0 : i32
    %c0_i32_1 = arith.constant 0 : i32
    %c0_i32_2 = arith.constant 0 : i32
    return %c0_i32, %c0_i32_0, %c0_i32_1 : i32, i32, i32
  }
  func.func @transform_5(%arg0: i32) -> (i32, i32) {
    %c0_i32 = arith.constant 0 : i32
    %c0_i32_0 = arith.constant 0 : i32
    %c0_i32_1 = arith.constant 0 : i32
    return %c0_i32, %c0_i32_0 : i32, i32
  }
  func.func @transform_6(%arg0: i32) -> (i32, i32) {
    %c0_i32 = arith.constant 0 : i32
    %c0_i32_0 = arith.constant 0 : i32
    %c0_i32_1 = arith.constant 0 : i32
    return %c0_i32, %c0_i32_0 : i32, i32
  }
  func.func @transform_7(%arg0: i32) -> (i32, i32) {
    %c0_i32 = arith.constant 0 : i32
    %c0_i32_0 = arith.constant 0 : i32
    %c0_i32_1 = arith.constant 0 : i32
    return %c0_i32, %c0_i32_0 : i32, i32
  }
  func.func @transform_8(%arg0: i32) -> (i32, i32) {
    %c0_i32 = arith.constant 0 : i32
    %c0_i32_0 = arith.constant 0 : i32
    %c0_i32_1 = arith.constant 0 : i32
    return %c0_i32, %c0_i32_0 : i32, i32
  }
  func.func @transform_9(%arg0: i32) -> (i32, i32, i32) {
    %c0_i32 = arith.constant 0 : i32
    %c0_i32_0 = arith.constant 0 : i32
    %c0_i32_1 = arith.constant 0 : i32
    return %arg0, %c0_i32, %c0_i32_0 : i32, i32, i32
  }
}

</mosaic_0001>

<bundles_post_ra>
// kernel: discriminator_forward.3
= control target key start
LH: loop header
LB: loop body
LE: loop exit
PB: predicated region body
PF: predicated region fallthrough
CT: control target
= control target key end

     0   :  { %s533_s15 = smov 0   ;;  %s572_s0 = inlined_call_operand.vmem [shape: bf16[128,48], index: 0, kind: input, shape index: {}]   ;;  %s573_s1 = inlined_call_operand.vmem [shape: bf16[48,128], index: 1, kind: input, shape index: {}]   ;;  %s574_s2 = inlined_call_operand.vmem [shape: f32[1,128], index: 2, kind: input, shape index: {}]   ;;  %s575_s3 = inlined_call_operand.vmem [shape: f32[1,128], index: 3, kind: input, shape index: {}]   ;;  %s576_s4 = inlined_call_operand.vmem [shape: bf16[128,128], index: 4, kind: output, shape index: {}]  }
   0x1 LB: > { %s408_s16 = sadd.s32 4294967295, %s506_s15   ;;  %p412_p0 = scmp.ge.s32.totalorder %s506_s15, 1  ;;  %s506_s15 = sphi %s533_s15, %s14_s15  }
   0x2   : > { %p163_p1 = scmp.lt.s32.totalorder %s506_s15, 3 }
   0x4   : > { %p164_p2 = pnand %p412_p0, %p163_p1 }
   0x5   : > { %s413_s19 = sshll.u32 (!%p164_p2), %s408_s16, 3 }
   0x6   : > { %167 = sbr.rel (%p164_p2) target bundleno = 175 (0xaf), region = 36  ;;  %p190_p3 = scmp.lt.s32.totalorder (!%p164_p2), %s413_s19, 15 }
   0xb   : > { %v457_v0 = vld [vmem:[%s573_s1 + $0x10] sm:$0xff]  ;;  %v456_v1 = vld [vmem:[%s573_s1 + $0x8] sm:$0xff]  ;;  %s578_s19 = smov (!%p190_p3, %s413_s19), 15  ;;  %v455_v2 = vld [vmem:[%s573_s1] sm:$0xff]  ;;  %vm258_vm0 = vcmask 392192  }
   0xc   : > { %276 = vmatpush.bf16.msra.mxu0 %v457_v0  ;;  %481 = vmatpush.bf16.msra.mxu1 %v457_v0  ;;  %s414_s22 = sshll.u32 %s578_s19, 2  ;;  %v498_v7 = vld [vmem:[%s574_s2] ss:$0 sm:$0xff] }
   0xd   : > { %482 = vmatpush.bf16.msra.mxu2 %v457_v0  ;;  %483 = vmatpush.bf16.msra.mxu3 %v457_v0  ;;  %s193_s27 = scalar_lea.vmem %s572_s0, %s414_s22  ;;  %v499_v17 = vld [vmem:[%s575_s3] ss:$0 sm:$0xff]  ;;  %s199_s8 = scalar_lea.vmem %s576_s4, %s414_s22 }
   0xe   : > { %v451_v3 = vld [vmem:[%s193_s27] sm:$0xff]  ;;  %v452_v4 = vld [vmem:[%s193_s27 + $0x8] sm:$0xff]  ;;  %v453_v5 = vld [vmem:[%s193_s27 + $0x10] sm:$0xff] }
   0xf   : > { %v454_v6 = vld [vmem:[%s193_s27 + $0x18] sm:$0xff] }
  0x10   : > { %277 = vmatpush.bf16.msra.mxu0 %v456_v1  ;;  %484 = vmatpush.bf16.msra.mxu1 %v456_v1 }
  0x11   : > { %485 = vmatpush.bf16.msra.mxu2 %v456_v1  ;;  %486 = vmatpush.bf16.msra.mxu3 %v456_v1 }
  0x14   : > { %278 = vmatpush.bf16.msra.mxu0 %v455_v2  ;;  %487 = vmatpush.bf16.msra.mxu1 %v455_v2 }
  0x15   : > { %488 = vmatpush.bf16.msra.mxu2 %v455_v2  ;;  %489 = vmatpush.bf16.msra.mxu3 %v455_v2 }
  0x17   : > { %445 = vmatmul.msk.bf16.vlgmr.msra.gmra.mxu0 %vm258_vm0, %v451_v3  ;;  %446 = vmatmul.msk.bf16.vlgmr.msra.gmra.mxu1 %vm258_vm0, %v452_v4 }
  0x18   : > { %447 = vmatmul.msk.bf16.vlgmr.msra.gmra.mxu2 %vm258_vm0, %v453_v5  ;;  %448 = vmatmul.msk.bf16.vlgmr.msra.gmra.mxu3 %vm258_vm0, %v454_v6 }
  0x94   : > { %v280_v8 = vpop.f32.mrf.mxu0  ;;  %v285_v9 = vpop.f32.mrf.mxu1 }
  0x95   : > { %v281_v10 = vadd.f32 %v498_v7, %v280_v8  ;;  %v286_v11 = vadd.f32 %v498_v7, %v285_v9 }
  0x97   : > { %v308_v12 = vmul.f32 0.2, %v281_v10  ;;  %v310_v13 = vmul.f32 0.2, %v286_v11  ;;  %vm300_vm1 = vcmp.ge.f32.partialorder %v281_v10, 0.0  ;;  %vm302_vm2 = vcmp.ge.f32.partialorder %v286_v11, 0.0 }
  0x99   : > { %v316_v16 = vsel %vm300_vm1, %v281_v10, %v308_v12  ;;  %v318_v18 = vsel %vm302_vm2, %v286_v11, %v310_v13 }
  0x9a   : > { %v328_v27 = vadd.f32 %v499_v17, %v316_v16  ;;  %v330_v28 = vadd.f32 %v499_v17, %v318_v18 }
  0x9b   : > { %v290_v14 = vpop.f32.mrf.mxu2  ;;  %v295_v15 = vpop.f32.mrf.mxu3 }
  0x9c   : > { %v282_v19 = vpop.f32.mrf.mxu0  ;;  %v287_v20 = vpop.f32.mrf.mxu1  ;;  %v291_v21 = vadd.f32 %v498_v7, %v290_v14  ;;  %v296_v22 = vadd.f32 %v498_v7, %v295_v15 }
  0x9d   : > { %v283_v23 = vadd.f32 %v498_v7, %v282_v19  ;;  %v288_v24 = vadd.f32 %v498_v7, %v287_v20 }
  0x9e   : > { %v312_v29 = vmul.f32 0.2, %v291_v21  ;;  %v314_v30 = vmul.f32 0.2, %v296_v22  ;;  %vm304_vm5 = vcmp.ge.f32.partialorder %v291_v21, 0.0  ;;  %vm306_vm6 = vcmp.ge.f32.partialorder %v296_v22, 0.0 }
  0x9f   : > { %vm301_vm3 = vcmp.ge.f32.partialorder %v283_v23, 0.0  ;;  %v309_v25 = vmul.f32 0.2, %v283_v23  ;;  %vm303_vm4 = vcmp.ge.f32.partialorder %v288_v24, 0.0  ;;  %v311_v26 = vmul.f32 0.2, %v288_v24 }
  0xa0   : > { %v320_v41 = vsel %vm304_vm5, %v291_v21, %v312_v29  ;;  %v322_v42 = vsel %vm306_vm6, %v296_v22, %v314_v30 }
  0xa1   : > { %v317_v31 = vsel %vm301_vm3, %v283_v23, %v309_v25  ;;  %v319_v32 = vsel %vm303_vm4, %v288_v24, %v311_v26  ;;  %v332_v47 = vadd.f32 %v499_v17, %v320_v41  ;;  %v334_v48 = vadd.f32 %v499_v17, %v322_v42 }
  0xa2   : > { %v329_v33 = vadd.f32 %v499_v17, %v317_v31  ;;  %v331_v34 = vadd.f32 %v499_v17, %v319_v32 }
  0xa3   : > { %v292_v35 = vpop.f32.mrf.mxu2  ;;  %v297_v36 = vpop.f32.mrf.mxu3 }
  0xa4   : > { %v461_v37 = vpack.c.bf16 %v329_v33, %v328_v27  ;;  %v466_v38 = vpack.c.bf16 %v331_v34, %v330_v28  ;;  %v293_v39 = vadd.f32 %v498_v7, %v292_v35  ;;  %v298_v40 = vadd.f32 %v498_v7, %v297_v36 }
  0xa6   : > { %462 = vst [vmem:[%s199_s8] sm:$0xff] %v461_v37   ;;  %vm305_vm7 = vcmp.ge.f32.partialorder %v293_v39, 0.0  ;;  %v313_v43 = vmul.f32 0.2, %v293_v39  ;;  %vm307_vm8 = vcmp.ge.f32.partialorder %v298_v40, 0.0  ;;  %v315_v44 = vmul.f32 0.2, %v298_v40 }
  0xa7   : > { %478 = vst [vmem:[%s199_s8 + $0x8] sm:$0xff] %v466_v38  }
  0xa8   : > { %v321_v45 = vsel %vm305_vm7, %v293_v39, %v313_v43  ;;  %v323_v46 = vsel %vm307_vm8, %v298_v40, %v315_v44 }
  0xa9   : > { %v333_v49 = vadd.f32 %v499_v17, %v321_v45  ;;  %v335_v50 = vadd.f32 %v499_v17, %v323_v46 }
  0xab   : > { %v471_v51 = vpack.c.bf16 %v333_v49, %v332_v47  ;;  %v476_v52 = vpack.c.bf16 %v335_v50, %v334_v48 }
  0xad   : > { %479 = vst [vmem:[%s199_s8 + $0x10] sm:$0xff] %v471_v51  }
  0xae   : > { %480 = vst [vmem:[%s199_s8 + $0x18] sm:$0xff] %v476_v52  }
  0xaf PF: > { %s14_s15 = sadd.s32 1, %s506_s15  }
  0xb0   : > { %p11_p4 = scmp.ge.s32.totalorder %s14_s15, 4  }
  0xb2   :  { %13 = sbr.rel (!%p11_p4) target bundleno = 1 (0x1), region = 66 }

// kernel: discriminator_forward.4
= control target key start
LH: loop header
LB: loop body
LE: loop exit
PB: predicated region body
PF: predicated region fallthrough
CT: control target
= control target key end

     0   :  { %s599_s15 = smov 0   ;;  %s674_s0 = inlined_call_operand.vmem [shape: bf16[32,256], index: 0, kind: input, shape index: {}]   ;;  %s675_s1 = inlined_call_operand.vmem [shape: bf16[256,128], index: 1, kind: input, shape index: {}]   ;;  %s676_s2 = inlined_call_operand.vmem [shape: f32[1,128], index: 2, kind: input, shape index: {}]   ;;  %s677_s3 = inlined_call_operand.vmem [shape: f32[1,128], index: 3, kind: input, shape index: {}]   ;;  %s678_s4 = inlined_call_operand.vmem [shape: bf16[32,128], index: 4, kind: output, shape index: {}]  }
   0x1 LB: > { %s448_s16 = sadd.s32 4294967295, %s572_s15   ;;  %p452_p0 = scmp.ge.s32.totalorder %s572_s15, 1  ;;  %s572_s15 = sphi %s599_s15, %s14_s15  }
   0x2   : > { %p164_p1 = scmp.lt.s32.totalorder %s572_s15, 3 }
   0x4   : > { %p165_p2 = pnand %p452_p0, %p164_p1 }
   0x5   : > { %s453_s29 = sshll.u32 (!%p165_p2), %s448_s16, 1 }
   0x6   : > { %168 = sbr.rel (%p165_p2) target bundleno = 189 (0xbd), region = 36  ;;  %p192_p3 = scmp.lt.s32.totalorder (!%p165_p2), %s453_s29, 3 }
   0xb   : > { %v542_v0 = vld [vmem:[%s675_s1 + $0x38] sm:$0xff]  ;;  %v541_v2 = vld [vmem:[%s675_s1 + $0x30] sm:$0xff]  ;;  %v540_v4 = vld [vmem:[%s675_s1 + $0x28] sm:$0xff]  ;;  %s680_s29 = smov (!%p192_p3, %s453_s29), 3 }
   0xc   : > { %v550_v1 = vld [vmem:[%s675_s1 + $0x78] sm:$0xff]  ;;  %348 = vmatpush.bf16.msra.mxu0 %v542_v0  ;;  %v549_v3 = vld [vmem:[%s675_s1 + $0x70] sm:$0xff]  ;;  %v548_v5 = vld [vmem:[%s675_s1 + $0x68] sm:$0xff]  ;;  %s532_s17 = sshll.u32 %s680_s29, 3  ;;  %s457_s8 = sshll.u32 %s680_s29, 2 }
   0xd   : > { %362 = vmatpush.bf16.msra.mxu1 %v550_v1  ;;  %v539_v6 = vld [vmem:[%s675_s1 + $0x20] sm:$0xff]  ;;  %v538_v8 = vld [vmem:[%s675_s1 + $0x18] sm:$0xff]  ;;  %v537_v10 = vld [vmem:[%s675_s1 + $0x10] sm:$0xff]  ;;  %s196_s24 = scalar_lea.vmem %s674_s0, %s532_s17  ;;  %s202_s11 = scalar_lea.vmem %s678_s4, %s457_s8 }
   0xe   : > { %v547_v7 = vld [vmem:[%s675_s1 + $0x60] sm:$0xff]  ;;  %v546_v9 = vld [vmem:[%s675_s1 + $0x58] sm:$0xff]  ;;  %v545_v11 = vld [vmem:[%s675_s1 + $0x50] sm:$0xff] }
   0xf   : > { %v536_v12 = vld [vmem:[%s675_s1 + $0x8] sm:$0xff]  ;;  %v535_v14 = vld [vmem:[%s675_s1] sm:$0xff] }
  0x10   : > { %349 = vmatpush.bf16.msra.mxu0 %v541_v2  ;;  %v544_v13 = vld [vmem:[%s675_s1 + $0x48] sm:$0xff]  ;;  %v543_v15 = vld [vmem:[%s675_s1 + $0x40] sm:$0xff] }
  0x11   : > { %363 = vmatpush.bf16.msra.mxu1 %v549_v3  ;;  %v460_v16 = vld [vmem:[%s196_s24] sm:$0xf]  ;;  %v534_v17 = vld [vmem:[%s196_s24 + $0x4] sm:$0xf0]  ;;  %v533_v18 = vld [vmem:[%s196_s24 + $0x4] sm:$0xf] }
  0x12   : > { %v462_v19 = vld [vmem:[%s196_s24 + $0x8] sm:$0xf0]  ;;  %v461_v20 = vor.u32 %v534_v17, %v460_v16  ;;  %v564_v22 = vld [vmem:[%s676_s2] ss:$0 sm:$0xff] }
  0x13   : > { %v465_v21 = vor.u32 %v533_v18, %v462_v19  ;;  %v565_v32 = vld [vmem:[%s677_s3] ss:$0 sm:$0xff] }
  0x14   : > { %350 = vmatpush.bf16.msra.mxu0 %v540_v4 }
  0x15   : > { %364 = vmatpush.bf16.msra.mxu1 %v548_v5 }
  0x18   : > { %351 = vmatpush.bf16.msra.mxu0 %v539_v6 }
  0x19   : > { %365 = vmatpush.bf16.msra.mxu1 %v547_v7 }
  0x1c   : > { %352 = vmatpush.bf16.msra.mxu0 %v538_v8 }
  0x1d   : > { %366 = vmatpush.bf16.msra.mxu1 %v546_v9 }
  0x20   : > { %353 = vmatpush.bf16.msra.mxu0 %v537_v10 }
  0x21   : > { %367 = vmatpush.bf16.msra.mxu1 %v545_v11 }
  0x24   : > { %354 = vmatpush.bf16.msra.mxu0 %v536_v12 }
  0x25   : > { %368 = vmatpush.bf16.msra.mxu1 %v544_v13 }
  0x28   : > { %355 = vmatpush.bf16.msra.mxu0 %v535_v14 }
  0x29   : > { %369 = vmatpush.bf16.msra.mxu1 %v543_v15 }
  0x2b   : > { %356 = vmatmul.bf16.vlgmr.msra.gmra.mxu0 %v461_v20 }
  0x2c   : > { %370 = vmatmul.bf16.vlgmr.msra.gmra.mxu1 %v465_v21 }
  0xa8   : > { %v357_v23 = vpop.f32.mrf.mxu0 }
  0xa9   : > { %v371_v24 = vpop.f32.mrf.mxu1  ;;  %v358_v25 = vadd.f32 %v564_v22, %v357_v23 }
  0xab   : > { %v372_v26 = vadd.f32 %v371_v24, %v358_v25 }
  0xad   : > { %v378_v28 = vmul.f32 0.2, %v372_v26  ;;  %vm376_vm0 = vcmp.ge.f32.partialorder %v372_v26, 0.0 }
  0xaf   : > { %v380_v33 = vsel %vm376_vm0, %v372_v26, %v378_v28 }
  0xb0   : > { %v359_v27 = vpop.f32.mrf.mxu0  ;;  %v386_v36 = vadd.f32 %v565_v32, %v380_v33 }
  0xb1   : > { %v360_v29 = vadd.f32 %v564_v22, %v359_v27  ;;  %v373_v30 = vpop.f32.mrf.mxu1 }
  0xb3   : > { %v374_v31 = vadd.f32 %v373_v30, %v360_v29 }
  0xb5   : > { %vm377_vm1 = vcmp.ge.f32.partialorder %v374_v31, 0.0  ;;  %v379_v34 = vmul.f32 0.2, %v374_v31 }
  0xb7   : > { %v381_v35 = vsel %vm377_vm1, %v374_v31, %v379_v34 }
  0xb8   : > { %v387_v37 = vadd.f32 %v565_v32, %v381_v35 }
  0xba   : > { %v554_v38 = vpack.c.bf16 %v387_v37, %v386_v36 }
  0xbc   : > { %555 = vst [vmem:[%s202_s11] sm:$0xff] %v554_v38  }
  0xbd PF: > { %s14_s15 = sadd.s32 1, %s572_s15  }
  0xbe   : > { %p11_p4 = scmp.ge.s32.totalorder %s14_s15, 4  }
  0xc0   :  { %13 = sbr.rel (!%p11_p4) target bundleno = 1 (0x1), region = 66 }

// kernel: discriminator_forward.5
= control target key start
LH: loop header
LB: loop body
LE: loop exit
PB: predicated region body
PF: predicated region fallthrough
CT: control target
= control target key end

     0   :  { %s1308_s11 = smov 0   ;;  %s1488_s0 = inlined_call_operand.vmem [shape: bf16[2,4,512], index: 0, kind: input, shape index: {}]   ;;  %s1489_s1 = inlined_call_operand.vmem [shape: bf16[512,64], index: 1, kind: input, shape index: {}]   ;;  %s1490_s2 = inlined_call_operand.vmem [shape: f32[1,64], index: 2, kind: input, shape index: {}]   ;;  %s1491_s3 = inlined_call_operand.vmem [shape: f32[1,64], index: 3, kind: input, shape index: {}]   ;;  %s1492_s4 = inlined_call_operand.vmem [shape: bf16[4,64,128], index: 4, kind: input, shape index: {}]   ;;  %s1493_s5 = inlined_call_operand.vmem [shape: f32[1,128], index: 5, kind: input, shape index: {}]   ;;  %s1494_s6 = inlined_call_operand.vmem [shape: f32[1,128], index: 6, kind: input, shape index: {}]   ;;  %s1495_s7 = inlined_call_operand.vmem [shape: f32[1,128], index: 7, kind: input, shape index: {}]   ;;  %s1496_s8 = inlined_call_operand.<no memory space> [shape: f32[1,1], index: 8, kind: input, shape index: {}]   ;;  %s1497_s9 = inlined_call_operand.vmem [shape: f32[2,1,1], index: 9, kind: output, shape index: {}]  }
   0x1   :  { %v14_v0 = vstv %s1496_s8 }
   0x2   :  { %15 = vst [vmem:[#allocation2] sm:$0x1] %v14_v0 }
   0x3 LB: > { %s955_s12 = sadd.s32 4294967295, %s1253_s11   ;;  %p959_p0 = scmp.ge.s32.totalorder %s1253_s11, 1  ;;  %s1253_s11 = sphi %s1308_s11, %s21_s11  }
   0x4   : > { %p289_p1 = scmp.lt.s32.totalorder %s1253_s11, 3 }
   0x6   : > { %p290_p2 = pnand %p959_p0, %p289_p1 }
   0x7   : > { %p323_p3 = scmp.lt.s32.totalorder (!%p290_p2), %s955_s12, 1 }
   0x8   : > { %293 = sbr.rel (%p290_p2) target bundleno = 490 (0x1ea), region = 56 }
   0xd   : > { %v1192_v1 = vld [vmem:[%s1489_s1 + $0x38] sm:$0xff]  ;;  %v1191_v5 = vld [vmem:[%s1489_s1 + $0x30] sm:$0xff]  ;;  %s1499_s12 = smov (!%p323_p3, %s955_s12), 1  ;;  %v1190_v9 = vld [vmem:[%s1489_s1 + $0x28] sm:$0xff]  ;;  %vm700_vm1 = vcmask 523264   ;;  %vm878_vm3 = vcmask 1040384  }
   0xe   : > { %v1200_v2 = vld [vmem:[%s1489_s1 + $0x78] sm:$0xff]  ;;  %608 = vmatpush.bf16.msra.mxu0 %v1192_v1  ;;  %v1199_v6 = vld [vmem:[%s1489_s1 + $0x70] sm:$0xff]  ;;  %s1184_s28 = sshll.u32 %s1499_s12, 3  ;;  %v1198_v10 = vld [vmem:[%s1489_s1 + $0x68] sm:$0xff]  ;;  %s330_s24 = scalar_lea.vmem %s1497_s9, %s1499_s12  ;;  %vm906_vm8 = vcmask 0  }
   0xf   : > { %v1208_v3 = vld [vmem:[%s1489_s1 + $0xb8] sm:$0xff]  ;;  %621 = vmatpush.bf16.msra.mxu1 %v1200_v2  ;;  %v1207_v7 = vld [vmem:[%s1489_s1 + $0xb0] sm:$0xff]  ;;  %v1206_v11 = vld [vmem:[%s1489_s1 + $0xa8] sm:$0xff]  ;;  %s327_s19 = scalar_lea.vmem %s1488_s0, %s1184_s28 }
  0x10   : > { %v1216_v4 = vld [vmem:[%s1489_s1 + $0xf8] sm:$0xff]  ;;  %634 = vmatpush.bf16.msra.mxu2 %v1208_v3  ;;  %v1215_v8 = vld [vmem:[%s1489_s1 + $0xf0] sm:$0xff]  ;;  %v1214_v12 = vld [vmem:[%s1489_s1 + $0xe8] sm:$0xff] }
  0x11   : > { %647 = vmatpush.bf16.msra.mxu3 %v1216_v4  ;;  %v1189_v13 = vld [vmem:[%s1489_s1 + $0x20] sm:$0xff]  ;;  %v1188_v18 = vld [vmem:[%s1489_s1 + $0x18] sm:$0xff]  ;;  %v1187_v22 = vld [vmem:[%s1489_s1 + $0x10] sm:$0xff] }
  0x12   : > { %609 = vmatpush.bf16.msra.mxu0 %v1191_v5  ;;  %v1197_v14 = vld [vmem:[%s1489_s1 + $0x60] sm:$0xff]  ;;  %v1196_v19 = vld [vmem:[%s1489_s1 + $0x58] sm:$0xff]  ;;  %v1195_v23 = vld [vmem:[%s1489_s1 + $0x50] sm:$0xff] }
  0x13   : > { %622 = vmatpush.bf16.msra.mxu1 %v1199_v6  ;;  %v402_v15 = vld [vmem:[%s327_s19] sm:$0xff]  ;;  %v1204_v20 = vld [vmem:[%s1489_s1 + $0x98] sm:$0xff]  ;;  %v1203_v24 = vld [vmem:[%s1489_s1 + $0x90] sm:$0xff] }
  0x14   : > { %635 = vmatpush.bf16.msra.mxu2 %v1207_v7  ;;  %v1205_v16 = vld [vmem:[%s1489_s1 + $0xa0] sm:$0xff]  ;;  %407 = vst [vmem:[#allocation1] ss:$4 sm:$0xff] %v402_v15  ;;  %v1212_v21 = vld [vmem:[%s1489_s1 + $0xd8] sm:$0xff]  ;;  %v1211_v25 = vld [vmem:[%s1489_s1 + $0xd0] sm:$0xff] }
  0x15   : > { %648 = vmatpush.bf16.msra.mxu3 %v1215_v8  ;;  %v1213_v17 = vld [vmem:[%s1489_s1 + $0xe0] sm:$0xff]  ;;  %v1186_v26 = vld [vmem:[%s1489_s1 + $0x8] sm:$0xff]  ;;  %v1220_v38 = vld [vmem:[%s1492_s4 + $0x18] sm:$0xff] }
  0x16   : > { %610 = vmatpush.bf16.msra.mxu0 %v1190_v9  ;;  %v1194_v27 = vld [vmem:[%s1489_s1 + $0x48] sm:$0xff]  ;;  %v1185_v30 = vld [vmem:[%s1489_s1] sm:$0xff]  ;;  %v1228_v39 = vld [vmem:[%s1492_s4 + $0x58] sm:$0xff] }
  0x17   : > { %623 = vmatpush.bf16.msra.mxu1 %v1198_v10  ;;  %v1202_v28 = vld [vmem:[%s1489_s1 + $0x88] sm:$0xff]  ;;  %v1193_v31 = vld [vmem:[%s1489_s1 + $0x40] sm:$0xff]  ;;  %v1224_v40 = vld [vmem:[%s1492_s4 + $0x38] sm:$0xff] }
  0x18   : > { %636 = vmatpush.bf16.msra.mxu2 %v1206_v11  ;;  %v1210_v29 = vld [vmem:[%s1489_s1 + $0xc8] sm:$0xff]  ;;  %v1201_v32 = vld [vmem:[%s1489_s1 + $0x80] sm:$0xff]  ;;  %v1232_v41 = vld [vmem:[%s1492_s4 + $0x78] sm:$0xff] }
  0x19   : > { %649 = vmatpush.bf16.msra.mxu3 %v1214_v12  ;;  %v1209_v33 = vld [vmem:[%s1489_s1 + $0xc0] sm:$0xff]  ;;  %v1219_v42 = vld [vmem:[%s1492_s4 + $0x10] sm:$0xff]  ;;  %v1218_v46 = vld [vmem:[%s1492_s4 + $0x8] sm:$0xff] }
  0x1a   : > { %611 = vmatpush.bf16.msra.mxu0 %v1189_v13  ;;  %v1227_v43 = vld [vmem:[%s1492_s4 + $0x50] sm:$0xff]  ;;  %v1226_v47 = vld [vmem:[%s1492_s4 + $0x48] sm:$0xff]  ;;  %v1217_v50 = vld [vmem:[%s1492_s4] sm:$0xff] }
  0x1b   : > { %624 = vmatpush.bf16.msra.mxu1 %v1197_v14  ;;  %v408_v34 = vld.sshfl [vmem:[#allocation1] sm:$0xff pattern:$0x73625140]  ;;  %v409_v35 = vld.sshfl [vmem:[#allocation1 + $0x8] sm:$0xff pattern:$0x73625140] }
  0x1c   : > { %637 = vmatpush.bf16.msra.mxu2 %v1205_v16  ;;  %v410_v36 = vld.sshfl [vmem:[#allocation1 + $0x10] sm:$0xff pattern:$0x73625140]  ;;  %v411_v37 = vld.sshfl [vmem:[#allocation1 + $0x18] sm:$0xff pattern:$0x73625140] }
  0x1d   : > { %650 = vmatpush.bf16.msra.mxu3 %v1213_v17  ;;  %v1223_v44 = vld [vmem:[%s1492_s4 + $0x30] sm:$0xff]  ;;  %v1222_v48 = vld [vmem:[%s1492_s4 + $0x28] sm:$0xff]  ;;  %v1225_v51 = vld [vmem:[%s1492_s4 + $0x40] sm:$0xff] }
  0x1e   : > { %612 = vmatpush.bf16.msra.mxu0 %v1188_v18  ;;  %v1231_v45 = vld [vmem:[%s1492_s4 + $0x70] sm:$0xff]  ;;  %v1230_v49 = vld [vmem:[%s1492_s4 + $0x68] sm:$0xff]  ;;  %v1221_v52 = vld [vmem:[%s1492_s4 + $0x20] sm:$0xff] }
  0x1f   : > { %625 = vmatpush.bf16.msra.mxu1 %v1196_v19  ;;  %v1229_v53 = vld [vmem:[%s1492_s4 + $0x60] sm:$0xff] }
  0x20   : > { %638 = vmatpush.bf16.msra.mxu2 %v1204_v20  ;;  %v1241_v54 = vld [vmem:[%s1490_s2] ss:$0 sm:$0xff] }
  0x21   : > { %651 = vmatpush.bf16.msra.mxu3 %v1212_v21  ;;  %v1242_v1 = vld [vmem:[%s1491_s3] ss:$0 sm:$0xff] }
  0x22   : > { %613 = vmatpush.bf16.msra.mxu0 %v1187_v22  ;;  %v398_v11 = vld [vmem:[%s1493_s5] sm:$0x1] }
  0x23   : > { %626 = vmatpush.bf16.msra.mxu1 %v1195_v23  ;;  %v399_v23 = vld [vmem:[%s1494_s6] sm:$0x1] }
  0x24   : > { %639 = vmatpush.bf16.msra.mxu2 %v1203_v24  ;;  %v400_v24 = vld [vmem:[%s1495_s7] sm:$0x1] }
  0x25   : > { %652 = vmatpush.bf16.msra.mxu3 %v1211_v25 }
  0x26   : > { %614 = vmatpush.bf16.msra.mxu0 %v1186_v26 }
  0x27   : > { %627 = vmatpush.bf16.msra.mxu1 %v1194_v27 }
  0x28   : > { %640 = vmatpush.bf16.msra.mxu2 %v1202_v28 }
  0x29   : > { %653 = vmatpush.bf16.msra.mxu3 %v1210_v29 }
  0x2a   : > { %615 = vmatpush.bf16.msra.mxu0 %v1185_v30 }
  0x2b   : > { %628 = vmatpush.bf16.msra.mxu1 %v1193_v31  ;;  %v401_v31 = vld [vmem:[#allocation2] sm:$0x1] }
  0x2c   : > { %641 = vmatpush.bf16.msra.mxu2 %v1201_v32 }
  0x2d   : > { %654 = vmatpush.bf16.msra.mxu3 %v1209_v33  ;;  %616 = vmatmul.bf16.vlgmr.msra.gmra.mxu0 %v408_v34 }
  0x2e   : > { %629 = vmatmul.bf16.vlgmr.msra.gmra.mxu1 %v409_v35  ;;  %708 = vmatpush.bf16.msrb.mxu0 %v1220_v38 }
  0x2f   : > { %642 = vmatmul.bf16.vlgmr.msra.gmra.mxu2 %v410_v36  ;;  %760 = vmatpush.bf16.msrb.mxu1 %v1224_v40 }
  0x30   : > { %655 = vmatmul.bf16.vlgmr.msra.gmra.mxu3 %v411_v37  ;;  %812 = vmatpush.bf16.msrb.mxu2 %v1228_v39 }
  0x31   : > { %863 = vmatpush.bf16.msrb.mxu3 %v1232_v41 }
  0x32   : > { %709 = vmatpush.bf16.msrb.mxu0 %v1219_v42 }
  0x33   : > { %761 = vmatpush.bf16.msrb.mxu1 %v1223_v44 }
  0x34   : > { %813 = vmatpush.bf16.msrb.mxu2 %v1227_v43 }
  0x35   : > { %864 = vmatpush.bf16.msrb.mxu3 %v1231_v45 }
  0x36   : > { %710 = vmatpush.bf16.msrb.mxu0 %v1218_v46 }
  0x37   : > { %762 = vmatpush.bf16.msrb.mxu1 %v1222_v48 }
  0x38   : > { %814 = vmatpush.bf16.msrb.mxu2 %v1226_v47 }
  0x39   : > { %865 = vmatpush.bf16.msrb.mxu3 %v1230_v49 }
  0x3a   : > { %711 = vmatpush.bf16.msrb.mxu0 %v1217_v50 }
  0x3b   : > { %763 = vmatpush.bf16.msrb.mxu1 %v1221_v52 }
  0x3c   : > { %815 = vmatpush.bf16.msrb.mxu2 %v1225_v51 }
  0x3d   : > { %866 = vmatpush.bf16.msrb.mxu3 %v1229_v53 }
  0xaa   : > { %v617_v55 = vpop.f32.mrf.mxu0 }
  0xab   : > { %v630_v56 = vpop.f32.mrf.mxu1  ;;  %v618_v57 = vadd.f32 %v1241_v54, %v617_v55 }
  0xad   : > { %v631_v58 = vadd.f32 %v630_v56, %v618_v57 }
  0xb2   : > { %v643_v59 = vpop.f32.mrf.mxu2  ;;  %v619_v62 = vpop.f32.mrf.mxu0 }
  0xb3   : > { %v656_v60 = vpop.f32.mrf.mxu3  ;;  %v644_v61 = vadd.f32 %v643_v59, %v631_v58  ;;  %v632_v63 = vpop.f32.mrf.mxu1 }
  0xb5   : > { %v657_v0 = vadd.f32 %v656_v60, %v644_v61 }
  0xb7   : > { %vm660_vm0 = vcmp.ge.f32.partialorder %v657_v0, 0.0  ;;  %v661_v2 = vmul.f32 0.2, %v657_v0 }
  0xb9   : > { %v662_v3 = vsel %vm660_vm0, %v657_v0, %v661_v2 }
  0xba   : > { %v666_v4 = vadd.f32 %v1242_v1, %v662_v3  ;;  %v645_v5 = vpop.f32.mrf.mxu2 }
  0xbb   : > { %v658_v6 = vpop.f32.mrf.mxu3 }
  0xbc   : > { %v667_v7 = vpack.c.bf16 %v666_v4, %v666_v4 }
  0xbe   : > { %1106 = vmatmul.msk.bf16.vlgmr.msrb.gmra.mxu0 %vm700_vm1, %v667_v7  ;;  %v727_v8 = vshrl.u32 %v667_v7, 16  ;;  %v780_v9 = vrot.slane %v667_v7, 1 }
  0xc0   : > { %1131 = vmatmul.msk.bf16.vlgmr.msrb.gmra.mxu1 %vm700_vm1, %v727_v8  ;;  %1156 = vmatmul.msk.bf16.vlgmr.msrb.gmra.mxu2 %vm700_vm1, %v780_v9  ;;  %v831_v10 = vrot.slane %v727_v8, 1 }
  0xc2   : > { %1181 = vmatmul.msk.bf16.vlgmr.msrb.gmra.mxu3 %vm700_vm1, %v831_v10 }
 0x13b   : > { %v713_v12 = vpop.f32.mrf.mxu0 }
 0x13c   : > { %v717_v14 = vadd.f32 %v713_v12, %v398_v11 }
 0x13d   : > { %v765_v13 = vpop.f32.mrf.mxu1 }
 0x13e   : > { %v769_v15 = vadd.f32 %v765_v13, %v717_v14 }
 0x143   : > { %v715_v16 = vpop.f32.mrf.mxu0  ;;  %v817_v17 = vpop.f32.mrf.mxu2 }
 0x144   : > { %v821_v18 = vadd.f32 %v817_v17, %v769_v15 }
 0x145   : > { %v767_v19 = vpop.f32.mrf.mxu1  ;;  %v868_v20 = vpop.f32.mrf.mxu3 }
 0x146   : > { %v872_v21 = vadd.f32 %v868_v20, %v821_v18 }
 0x148   : > { %vm873_vm2 = vcmp.ge.f32.partialorder %v872_v21, 0.0  ;;  %v874_v22 = vmul.f32 0.2, %v872_v21 }
 0x14a   : > { %v875_v25 = vsel %vm873_vm2, %v872_v21, %v874_v22 }
 0x14b   : > { %v819_v26 = vpop.f32.mrf.mxu2  ;;  %v876_v27 = vadd.f32 %v875_v25, %v399_v23 }
 0x14d   : > { %v870_v28 = vpop.f32.mrf.mxu3  ;;  %v877_v29 = vmul.f32 %v876_v27, %v400_v24 }
 0x14f   : > { %v879_v30 = vsel %vm878_vm3, %v877_v29, 0.0 }
 0x150   : > { %880 = vadd.xlane.f32.xlu0 %v879_v30 }
 0x1c3   : > { %v881_v32 = vpop.xlane.xlu0 %880 }
 0x1c4   : > { %v882_v33 = vadd.f32 %v881_v32, %v401_v31 }
 0x1c6   : > { %v883_v34 = vand.u32 2147483647, %v882_v33  ;;  %vm887_vm9 = vcmp.ge.f32.partialorder %v882_v33, 0.0 }
 0x1c8   : > { %v884_v35 = vsub.f32 0.0, %v883_v34 }
 0x1ca   : > { %v885_v36 = vmul.f32 1.442695, %v884_v35 }
 0x1cc   : > { %1243 = vpow2.f32 %v885_v36 }
 0x1d2   : > { %v1244_v37 = vpop.eup %1243 }
 0x1d3   : > { %v888_v38 = vadd.f32 1.0, %v1244_v37 }
 0x1d5   : > { %1245 = vrcp.f32 %v888_v38  ;;  %v900_v42 = vand.u32 2147483648, %v888_v38  ;;  %v898_v44 = vand.u32 2147483647, %v888_v38  ;;  %vm894_vm5 = vweird.f32 %v888_v38 }
 0x1d7   : > { %v901_v46 = vor.u32 1.1754944e-38, %v900_v42  ;;  %vm899_vm7 = vcmp.eq.f32.partialorder %v898_v44, 8.507059e+37 }
 0x1db   : > { %v1246_v39 = vpop.eup %1245 }
 0x1dc   : > { %v890_v40 = vmul.f32 %v1246_v39, %v888_v38  ;;  %vm895_vm4 = vweird.f32 %v1246_v39 }
 0x1dd   : > { %vm896_vm6 = vmor %vm894_vm5, %vm895_vm4 }
 0x1de   : > { %v891_v41 = vsub.f32 1.0, %v890_v40 }
 0x1e0   : > { %v892_v43 = vmul.f32 %v1246_v39, %v891_v41 }
 0x1e2   : > { %v893_v45 = vadd.f32 %v1246_v39, %v892_v43 }
 0x1e4   : > { %v897_v47 = vsel %vm896_vm6, %v1246_v39, %v893_v45 }
 0x1e5   : > { %v902_v48 = vsel %vm899_vm7, %v901_v46, %v897_v47 }
 0x1e6   : > { %v904_v49 = vmul.f32 %v1244_v37, %v902_v48 }
 0x1e8   : > { %v905_v50 = vsel %vm887_vm9, %v902_v48, %v904_v49 }
 0x1e9   : > { %907 = vst.msk [vmem:[%s330_s24] sm:$0x1] %vm906_vm8, %v905_v50 }
 0x1ea PF: > { %s21_s11 = sadd.s32 1, %s1253_s11  }
 0x1eb   : > { %p18_p4 = scmp.ge.s32.totalorder %s21_s11, 4  }
 0x1ed   :  { %20 = sbr.rel (!%p18_p4) target bundleno = 3 (0x3), region = 89 }

</bundles_post_ra>
